<compile_context>
chip_gen: v5e
topology: v5e:2x2
jax: 0.10.0
libtpu: 0.0.40
codegen_flags: <defaults>
</compile_context>

<pallas_src>
import functools

import jax
import jax.numpy as jnp
from jax.experimental import pallas as pl
from jax.experimental.pallas import tpu as pltpu

_NEG_FILL = -1e30  # finite mask value for out-of-range class columns


def _round_up(x, mult):
    return ((x + mult - 1) // mult) * mult


def _cosine_margin_ce_kernel(logits_ref, target_ref, xt_ref, loss_ref,
                             m_sc, l_sc, *, m, s, c, tc):
    k = pl.program_id(1)

    @pl.when(k == 0)
    def _init():
        m_sc[...] = jnp.full_like(m_sc, -jnp.inf)
        l_sc[...] = jnp.zeros_like(l_sc)

    x = logits_ref[...].astype(jnp.float32)               # (TN, TC) f32 compute
    tn, tcc = x.shape

    # Block-local class indices; target offset is a (TN,1) scalar-side subtract.
    local_ids = jax.lax.broadcasted_iota(jnp.int32, (tn, tcc), 1)
    t_local = target_ref[...] - k * tc                    # (TN, 1) int32
    is_target = local_ids == t_local                      # (TN, TC) bool

    z = x * s
    z = jnp.where(is_target, z - (s * m), z)              # margin at target column
    if c % tc != 0:
        # Ragged last class tile: mask out-of-range columns with a large finite
        # negative (underflows in exp; avoids inf-inf NaNs in the rescale).
        z = jnp.where(local_ids < (c - k * tc), z, _NEG_FILL)

    # Online logsumexp over the class axis.
    m_old = m_sc[...]
    m_new = jnp.maximum(m_old, jnp.max(z, axis=1, keepdims=True))
    alpha = jnp.exp(m_old - m_new)
    l_sc[...] = alpha * l_sc[...] + jnp.sum(jnp.exp(z - m_new), axis=1,
                                            keepdims=True)
    m_sc[...] = m_new

    @pl.when(k == pl.num_programs(1) - 1)
    def _finalize():
        # per-sample loss = logsumexp(z) - z[target],  z[target] = s*(x[target] - m)
        z_t = s * (xt_ref[...].astype(jnp.float32) - m)
        loss_ref[...] = (m_sc[...] + jnp.log(l_sc[...])) - z_t


def cosine_margin_cross_entropy(logits, target, m=0.35, s=32.0,
                                tn=None, tc=None, vmem_limit_bytes=None):
    """logits: (N, C) float (f32 or bf16), target: (N,) int. Scalar f32 mean loss."""
    n, c = logits.shape
    dtype = logits.dtype

    # Per-generation tuning: bigger tiles + higher scoped-VMEM budget on the
    # 128-MiB-VMEM, memory-bound chips (v5e/v6e); conservative on v7x (64 MiB).
    try:
        vmem_cap = pltpu.get_tpu_info().vmem_capacity_bytes
    except Exception:
        vmem_cap = 64 * 1024 * 1024
    big_vmem = vmem_cap >= 100 * 1024 * 1024
    if tc is None:
        tc = 8192 if big_vmem else 4096
    if tn is None:
        tn = 256
    if vmem_limit_bytes is None:
        vmem_limit_bytes = (64 if big_vmem else 32) * 1024 * 1024

    native_sub = 16 if dtype == jnp.bfloat16 else 8

    # Class tile: full extent when it fits (full-dim blocks are always legal),
    # otherwise a 128-multiple tile with an in-kernel mask on the ragged edge.
    tc_eff = c if c <= tc else tc

    # Batch tile: aim for >=2 tiles on the "parallel" axis (v7x has 2 TCs); a
    # full-extent block is always legal for small N.
    tn_eff = min(tn, _round_up(max(1, pl.cdiv(n, 2)), native_sub))
    if tn_eff >= n:
        tn_eff = n

    grid = (pl.cdiv(n, tn_eff), pl.cdiv(c, tc_eff))

    target_col = target.astype(jnp.int32).reshape(n, 1)
    # Target logit gathered once in the wrapper (~N elements of HBM traffic) so
    # the kernel needs no third full row-reduction.
    x_target = jnp.take_along_axis(logits, target_col, axis=1).astype(jnp.float32)

    kernel = functools.partial(_cosine_margin_ce_kernel,
                               m=float(m), s=float(s), c=c, tc=tc_eff)
    itemsize = jnp.dtype(dtype).itemsize

    per_sample = pl.pallas_call(
        kernel,
        out_shape=jax.ShapeDtypeStruct((n, 1), jnp.float32),
        grid_spec=pltpu.PrefetchScalarGridSpec(
            num_scalar_prefetch=0,
            grid=grid,
            in_specs=[
                pl.BlockSpec((tn_eff, tc_eff), lambda i, k: (i, k)),   # logits
                pl.BlockSpec((tn_eff, 1), lambda i, k: (i, 0)),        # target idx
                pl.BlockSpec((tn_eff, 1), lambda i, k: (i, 0)),        # target logit
            ],
            out_specs=pl.BlockSpec((tn_eff, 1), lambda i, k: (i, 0)),
            scratch_shapes=[
                pltpu.VMEM((tn_eff, 1), jnp.float32),   # running max
                pltpu.VMEM((tn_eff, 1), jnp.float32),   # running sum-exp
            ],
        ),
        compiler_params=pltpu.CompilerParams(
            dimension_semantics=("parallel", "arbitrary"),
            vmem_limit_bytes=vmem_limit_bytes,
        ),
        cost_estimate=pl.CostEstimate(
            flops=6 * n * c,
            transcendentals=n * c,
            bytes_accessed=n * c * itemsize + n * (4 + 4 + 4),
        ),
    )(logits, target_col, x_target)

    # Mean over the batch (nn.CrossEntropyLoss default reduction).
    return jnp.sum(per_sample[:, 0]) / jnp.float32(n)


if __name__ == "__main__":
    key = jax.random.PRNGKey(0)
    k_x, k_t = jax.random.split(key)

    N, C = 8, 32
    # Cosine-similarity-like logits in [-1, 1].
    logits = jax.random.uniform(k_x, (N, C), dtype=jnp.float32,
                                minval=-1.0, maxval=1.0)
    target = jax.random.randint(k_t, (N,), 0, C, dtype=jnp.int32)

    loss = cosine_margin_cross_entropy(logits, target, m=0.35, s=32.0)
    jax.block_until_ready(loss)

    # Reference check in plain JAX (same math as the PyTorch module).
    one_hot = jax.nn.one_hot(target, C, dtype=jnp.float32)
    z = 32.0 * (logits - one_hot * 0.35)
    ref = jnp.mean(jax.nn.logsumexp(z, axis=1) - jnp.sum(z * one_hot, axis=1))
    assert jnp.allclose(loss, ref, atol=1e-5, rtol=1e-5), (loss, ref)

    print("KERNEL_OK")
</pallas_src>

<mosaic_0001>
module attributes {stable_mosaic.version = 11 : i64} {
  func.func @_cosine_margin_ce_kernel(%arg0: i32, %arg1: i32, %arg2: memref<8x32xf32, #tpu.memory_space<vmem>>, %arg3: memref<8x1xi32, #tpu.memory_space<vmem>>, %arg4: memref<8x1xf32, #tpu.memory_space<vmem>>, %arg5: memref<8x1xf32, #tpu.memory_space<vmem>>, %arg6: memref<8x1xf32, #tpu.memory_space<vmem>>, %arg7: memref<8x1xf32, #tpu.memory_space<vmem>>) attributes {dimension_semantics = [#tpu.dimension_semantics<parallel>, #tpu.dimension_semantics<arbitrary>], iteration_bounds = array<i64: 1, 1>, scalar_prefetch = 0 : i64, scratch_operands = 2 : i64, tpu.core_type = #tpu.core_type<tc>, window_params = [{transform_indices = @transform_0, window_bounds = array<i64: 8, 32>}, {transform_indices = @transform_1, window_bounds = array<i64: 8, 1>}, {transform_indices = @transform_2, window_bounds = array<i64: 8, 1>}, {transform_indices = @transform_3, window_bounds = array<i64: 8, 1>}]} {
    %c0_i32 = arith.constant 0 : i32
    %0 = arith.cmpi eq, %arg1, %c0_i32 : i32
    %1 = arith.extui %0 : i1 to i32
    %c0_i32_0 = arith.constant 0 : i32
    %2 = arith.cmpi ne, %1, %c0_i32_0 : i32
    scf.if %2 {
      %cst_17 = arith.constant 0xFF800000 : f32
      %35 = vector.broadcast %cst_17 : f32 to vector<8x1xf32>
      %c0_18 = arith.constant 0 : index
      %c0_19 = arith.constant 0 : index
      %36 = vector.load %arg6[%c0_18, %c0_19] : memref<8x1xf32, #tpu.memory_space<vmem>>, vector<8x1xf32>
      tpu.vector_store %arg6[%c0_18, %c0_19], %35 {strides = array<i32>} : memref<8x1xf32, #tpu.memory_space<vmem>>, vector<8x1xf32>,
      %cst_20 = arith.constant 0.000000e+00 : f32
      %37 = vector.broadcast %cst_20 : f32 to vector<8x1xf32>
      %c0_21 = arith.constant 0 : index
      %c0_22 = arith.constant 0 : index
      %38 = vector.load %arg7[%c0_21, %c0_22] : memref<8x1xf32, #tpu.memory_space<vmem>>, vector<8x1xf32>
      tpu.vector_store %arg7[%c0_21, %c0_22], %37 {strides = array<i32>} : memref<8x1xf32, #tpu.memory_space<vmem>>, vector<8x1xf32>,
    } else {
    }
    %c0 = arith.constant 0 : index
    %c0_1 = arith.constant 0 : index
    %3 = vector.load %arg2[%c0, %c0_1] : memref<8x32xf32, #tpu.memory_space<vmem>>, vector<8x32xf32>
    %4 = tpu.iota {dimensions = array<i32: 1>} : vector<8x32xi32>
    %c0_2 = arith.constant 0 : index
    %c0_3 = arith.constant 0 : index
    %5 = vector.load %arg3[%c0_2, %c0_3] : memref<8x1xi32, #tpu.memory_space<vmem>>, vector<8x1xi32>
    %c32_i32 = arith.constant 32 : i32
    %6 = arith.muli %arg1, %c32_i32 : i32
    %7 = vector.broadcast %6 : i32 to vector<8x1xi32>
    %8 = arith.subi %5, %7 : vector<8x1xi32>
    %9 = vector.broadcast %8 : vector<8x1xi32> to vector<8x32xi32>
    %10 = arith.cmpi eq, %4, %9 : vector<8x32xi32>
    %cst = arith.constant 3.200000e+01 : f32
    %11 = vector.broadcast %cst : f32 to vector<8x32xf32>
    %12 = arith.mulf %3, %11 : vector<8x32xf32>
    %cst_4 = arith.constant 1.120000e+01 : f32
    %13 = vector.broadcast %cst_4 : f32 to vector<8x32xf32>
    %14 = arith.subf %12, %13 : vector<8x32xf32>
    %15 = arith.select %10, %14, %12 : vector<8x32xi1>, vector<8x32xf32>
    %c0_5 = arith.constant 0 : index
    %c0_6 = arith.constant 0 : index
    %16 = vector.load %arg6[%c0_5, %c0_6] : memref<8x1xf32, #tpu.memory_space<vmem>>, vector<8x1xf32>
    %cst_7 = arith.constant dense<0xFF800000> : vector<8xf32>
    %17 = vector.multi_reduction <maximumf>, %15, %cst_7 [1] : vector<8x32xf32> to vector<8xf32>
    %18 = vector.shape_cast %17 : vector<8xf32> to vector<8x1xf32>
    %19 = arith.maximumf %16, %18 : vector<8x1xf32>
    %20 = arith.subf %16, %19 : vector<8x1xf32>
    %21 = math.exp %20 : vector<8x1xf32>
    %c0_8 = arith.constant 0 : index
    %c0_9 = arith.constant 0 : index
    %22 = vector.load %arg7[%c0_8, %c0_9] : memref<8x1xf32, #tpu.memory_space<vmem>>, vector<8x1xf32>
    %23 = arith.mulf %21, %22 : vector<8x1xf32>
    %24 = vector.broadcast %19 : vector<8x1xf32> to vector<8x32xf32>
    %25 = arith.subf %15, %24 : vector<8x32xf32>
    %26 = math.exp %25 : vector<8x32xf32>
    %cst_10 = arith.constant dense<0.000000e+00> : vector<8xf32>
    %27 = vector.multi_reduction <add>, %26, %cst_10 [1] : vector<8x32xf32> to vector<8xf32>
    %28 = vector.shape_cast %27 : vector<8xf32> to vector<8x1xf32>
    %29 = arith.addf %23, %28 : vector<8x1xf32>
    %c0_11 = arith.constant 0 : index
    %c0_12 = arith.constant 0 : index
    %30 = vector.load %arg7[%c0_11, %c0_12] : memref<8x1xf32, #tpu.memory_space<vmem>>, vector<8x1xf32>
    tpu.vector_store %arg7[%c0_11, %c0_12], %29 {strides = array<i32>} : memref<8x1xf32, #tpu.memory_space<vmem>>, vector<8x1xf32>,
    %c0_13 = arith.constant 0 : index
    %c0_14 = arith.constant 0 : index
    %31 = vector.load %arg6[%c0_13, %c0_14] : memref<8x1xf32, #tpu.memory_space<vmem>>, vector<8x1xf32>
    tpu.vector_store %arg6[%c0_13, %c0_14], %19 {strides = array<i32>} : memref<8x1xf32, #tpu.memory_space<vmem>>, vector<8x1xf32>,
    %c0_i32_15 = arith.constant 0 : i32
    %32 = arith.cmpi eq, %arg1, %c0_i32_15 : i32
    %33 = arith.extui %32 : i1 to i32
    %c0_i32_16 = arith.constant 0 : i32
    %34 = arith.cmpi ne, %33, %c0_i32_16 : i32
    scf.if %34 {
      %c0_17 = arith.constant 0 : index
      %c0_18 = arith.constant 0 : index
      %35 = vector.load %arg4[%c0_17, %c0_18] : memref<8x1xf32, #tpu.memory_space<vmem>>, vector<8x1xf32>
      %cst_19 = arith.constant 3.500000e-01 : f32
      %36 = vector.broadcast %cst_19 : f32 to vector<8x1xf32>
      %37 = arith.subf %35, %36 : vector<8x1xf32>
      %cst_20 = arith.constant 3.200000e+01 : f32
      %38 = vector.broadcast %cst_20 : f32 to vector<8x1xf32>
      %39 = arith.mulf %38, %37 : vector<8x1xf32>
      %c0_21 = arith.constant 0 : index
      %c0_22 = arith.constant 0 : index
      %40 = vector.load %arg6[%c0_21, %c0_22] : memref<8x1xf32, #tpu.memory_space<vmem>>, vector<8x1xf32>
      %c0_23 = arith.constant 0 : index
      %c0_24 = arith.constant 0 : index
      %41 = vector.load %arg7[%c0_23, %c0_24] : memref<8x1xf32, #tpu.memory_space<vmem>>, vector<8x1xf32>
      %42 = math.log %41 : vector<8x1xf32>
      %43 = arith.addf %40, %42 : vector<8x1xf32>
      %44 = arith.subf %43, %39 : vector<8x1xf32>
      %c0_25 = arith.constant 0 : index
      %c0_26 = arith.constant 0 : index
      %45 = vector.load %arg5[%c0_25, %c0_26] : memref<8x1xf32, #tpu.memory_space<vmem>>, vector<8x1xf32>
      tpu.vector_store %arg5[%c0_25, %c0_26], %44 {strides = array<i32>} : memref<8x1xf32, #tpu.memory_space<vmem>>, vector<8x1xf32>,
    } else {
    }
    return
  }
  func.func @transform_0(%arg0: i32, %arg1: i32) -> (i32, i32) {
    %c0_i32 = arith.constant 0 : i32
    return %arg0, %arg1 : i32, i32
  }
  func.func @transform_1(%arg0: i32, %arg1: i32) -> (i32, i32) {
    %c0_i32 = arith.constant 0 : i32
    %c0_i32_0 = arith.constant 0 : i32
    return %arg0, %c0_i32 : i32, i32
  }
  func.func @transform_2(%arg0: i32, %arg1: i32) -> (i32, i32) {
    %c0_i32 = arith.constant 0 : i32
    %c0_i32_0 = arith.constant 0 : i32
    return %arg0, %c0_i32 : i32, i32
  }
  func.func @transform_3(%arg0: i32, %arg1: i32) -> (i32, i32) {
    %c0_i32 = arith.constant 0 : i32
    %c0_i32_0 = arith.constant 0 : i32
    return %arg0, %c0_i32 : i32, i32
  }
}

</mosaic_0001>

<bundles_post_ra>
// kernel: tpu_custom_call.1
= control target key start
LH: loop header
LB: loop body
LE: loop exit
PB: predicated region body
PF: predicated region fallthrough
CT: control target
= control target key end

     0   :  { %v91_v0 = vmov 0   ;;  %vm18_vm0 = vcmask 7168   ;;  %v92_v2 = vmov -inf   ;;  %v22_v4 = vlaneseq  ;;  %s133_s1 = inlined_call_operand.vmem [shape: s32[8,1], index: 1, kind: input, shape index: {}]   ;;  %s134_s0 = inlined_call_operand.vmem [shape: f32[8,32], index: 0, kind: input, shape index: {}]   ;;  %s135_s2 = inlined_call_operand.vmem [shape: f32[8,1], index: 2, kind: input, shape index: {}]   ;;  %s136_s3 = inlined_call_operand.vmem [shape: f32[8,1], index: 3, kind: output, shape index: {}]  }
   0x1   :  { %83 = vset.pattern.permute.xlu0 %v91_v0  ;;  %v24_v1 = vld [vmem:[%s133_s1] sm:$0xff]  ;;  %84 = vset.pattern.permute.xlu1 %v91_v0  ;;  %19 = vst.msk [vmem:[#allocation2] sm:$0xff] %vm18_vm0, %v92_v2  ;;  %vm36_vm1 = vcmask 261120   ;;  %v93_v11 = vmov 0.0  }
   0x2   :  { %29 = vperm.xlu0 %83, %v24_v1   ;;  %v21_v3 = vld [vmem:[%s134_s0] sm:$0xff]  ;;  %v23_v6 = vand.u32 127, %v22_v4  ;;  %20 = vst.msk [vmem:[#allocation3] sm:$0xff] %vm18_vm0, %v93_v11 }
   0x3   :  { %v32_v5 = vmul.f32 32.0, %v21_v3  ;;  %v64_v28 = vld [vmem:[%s135_s2] sm:$0xff] }
   0x4   :  { %v79_v29 = vadd.f32 -0.35, %v64_v28 }
   0x5   :  { %v78_v7 = vadd.f32 -11.2, %v32_v5 }
   0x6   :  { %v66_v31 = vmul.f32 32.0, %v79_v29 }
   0x8   :  { %v35_v12 = vld [vmem:[#allocation2] sm:$0xff] }
   0x9   :  { %v44_v23 = vld [vmem:[#allocation3] sm:$0xff] }
  0x74   :  { %v30_v8 = vpop.permute.xlu0 %29 }
  0x75   :  { %vm31_vm2 = vcmp.eq.s32.totalorder %v23_v6, %v30_v8 }
  0x76   :  { %v34_v9 = vsel %vm31_vm2, %v78_v7, %v32_v5 }
  0x77   :  { %v37_v10 = vsel %vm36_vm1, %v34_v9, -inf }
  0x78   :  { %38 = vmax.xlane.f32.xlu0 %v37_v10 }
  0xeb   :  { %v39_v13 = vpop.xlane.xlu0 %38 }
  0xec   :  { %v40_v14 = vmax.f32 %v35_v12, %v39_v13 }
  0xee   :  { %v41_v15 = vsub.f32 %v35_v12, %v40_v14  ;;  %60 = vst.msk [vmem:[#allocation2] sm:$0xff] %vm18_vm0, %v40_v14  ;;  %48 = vperm.xlu1 %84, %v40_v14  }
  0xf0   :  { %v42_v21 = vmul.f32 1.442695, %v41_v15 }
  0xf5   :  { %v67_v33 = vld [vmem:[#allocation2] sm:$0xff] }
 0x160   :  { %v49_v16 = vpop.permute.xlu1 %48 }
 0x161   :  { %v51_v17 = vsub.f32 %v34_v9, %v49_v16 }
 0x163   :  { %v52_v18 = vmul.f32 1.442695, %v51_v17 }
 0x165   :  { %85 = vpow2.f32 %v52_v18 }
 0x166   :  { %87 = vpow2.f32 %v42_v21 }
 0x16b   :  { %v86_v19 = vpop.eup %85 }
 0x16c   :  { %v54_v20 = vsel %vm36_vm1, %v86_v19, 0.0  ;;  %v88_v22 = vpop.eup %87 }
 0x16d   :  { %55 = vadd.xlane.f32.xlu1 %v54_v20  ;;  %v45_v24 = vmul.f32 %v88_v22, %v44_v23 }
 0x1e0   :  { %v56_v25 = vpop.xlane.xlu1 %55 }
 0x1e1   :  { %v57_v26 = vadd.f32 %v56_v25, %v45_v24 }
 0x1e3   :  { %59 = vst.msk [vmem:[#allocation3] sm:$0xff] %vm18_vm0, %v57_v26 }
 0x1ea   :  { %v68_v27 = vld [vmem:[#allocation3] sm:$0xff] }
 0x1eb   :  { %89 = vlog2.f32 %v68_v27 }
 0x1f1   :  { %v90_v30 = vpop.eup %89 }
 0x1f2   :  { %v70_v32 = vmul.f32 0.6931472, %v90_v30 }
 0x1f4   :  { %v71_v34 = vadd.f32 %v70_v32, %v67_v33 }
 0x1f6   :  { %v72_v35 = vsub.f32 %v71_v34, %v66_v31 }
 0x1f8   :  { %73 = vst.msk [vmem:[%s136_s3] sm:$0xff] %vm18_vm0, %v72_v35 }

</bundles_post_ra>
